<compile_context>
chip_gen: v5e
topology: v5e:2x2
jax: 0.10.0
libtpu: 0.0.40
codegen_flags: <defaults>
</compile_context>

<pallas_src>
import functools

import jax
import jax.numpy as jnp
from jax.experimental import pallas as pl
from jax.experimental.pallas import tpu as pltpu


# ----------------------------------------------------------------------------
# helpers
# ----------------------------------------------------------------------------
def _round_up(x, m):
    return (x + m - 1) // m * m


def _tile_and_pad(dim, cap):
    """Pick a lane-aligned tile <= cap and the padded dim it evenly divides."""
    assert cap % 128 == 0
    p = _round_up(dim, 128)
    t = min(p, cap)
    return t, _round_up(p, t)


def _pad2d(a, rows, cols):
    r, c = a.shape
    return jnp.pad(a, ((0, rows - r), (0, cols - c)))


# ----------------------------------------------------------------------------
# Kernel 1: tiled  y = x @ W + b  (optional ReLU), K-reduction accumulator
# ----------------------------------------------------------------------------
def _linear_kernel(x_ref, w_ref, b_ref, o_ref, acc_ref, *, apply_relu):
    k = pl.program_id(1)

    @pl.when(k == 0)
    def _():
        acc_ref[...] = jnp.zeros_like(acc_ref)

    w = w_ref[...]
    acc_ref[...] += jnp.dot(x_ref[...].astype(w.dtype), w,
                            preferred_element_type=jnp.float32)

    @pl.when(k == pl.num_programs(1) - 1)
    def _():
        y = acc_ref[...] + b_ref[...].astype(jnp.float32)
        if apply_relu:
            y = jnp.maximum(y, 0.0)
        o_ref[...] = y.astype(o_ref.dtype)


def pallas_linear(x, w, b, *, apply_relu, tk, tn):
    """x: (M, K) f32, w: (K, N) bf16/f32, b: (1, N) f32 -> (M, N) f32."""
    M, K = x.shape
    Kw, N = w.shape
    assert K == Kw and b.shape == (1, N)
    assert M % 8 == 0 and K % tk == 0 and N % tn == 0

    cost = pl.CostEstimate(
        flops=2 * M * K * N,
        transcendentals=0,
        bytes_accessed=int(K * N * w.dtype.itemsize + M * (K + N) * 4 + N * 4))

    return pl.pallas_call(
        functools.partial(_linear_kernel, apply_relu=apply_relu),
        out_shape=jax.ShapeDtypeStruct((M, N), jnp.float32),
        grid_spec=pltpu.PrefetchScalarGridSpec(
            num_scalar_prefetch=0,
            grid=(N // tn, K // tk),
            in_specs=[
                pl.BlockSpec((M, tk), lambda j, k: (0, k)),
                pl.BlockSpec((tk, tn), lambda j, k: (k, j)),
                pl.BlockSpec((1, tn), lambda j, k: (0, j)),
            ],
            out_specs=pl.BlockSpec((M, tn), lambda j, k: (0, j)),
            scratch_shapes=[pltpu.VMEM((M, tn), jnp.float32)],
        ),
        compiler_params=pltpu.CompilerParams(
            dimension_semantics=("parallel", "arbitrary")),
        cost_estimate=cost,
    )(x, w, b)


# ----------------------------------------------------------------------------
# Kernel 2: fused stack of L Residual layers  h <- (h @ W_l + b_l) + relu(h)
# Activation stays resident in VMEM (tile-major) across all layers; only the
# bf16 weights stream from HBM.  All dynamic VMEM indexing is on leading axes.
# ----------------------------------------------------------------------------
def _residual_stack_kernel(h0_ref, w_ref, b_ref, o_ref,
                           h_in, h_out, acc_ref, *, tile, nt):
    l = pl.program_id(0)
    j = pl.program_id(1)
    k = pl.program_id(2)
    nl = pl.num_programs(0)
    nj = pl.num_programs(1)
    nk = pl.num_programs(2)

    # Very first grid step: load the resident first-layer activation into the
    # tile-major VMEM buffer (static lane-dim slices, static leading index).
    @pl.when((l == 0) & (j == 0) & (k == 0))
    def _():
        for t in range(nt):
            h_in[t] = h0_ref[:, t * tile:(t + 1) * tile]

    @pl.when(k == 0)
    def _():
        acc_ref[...] = jnp.zeros_like(acc_ref)

    w = w_ref[...]
    acc_ref[...] += jnp.dot(h_in[k].astype(w.dtype), w,
                            preferred_element_type=jnp.float32)

    @pl.when(k == nk - 1)
    def _():
        # Epilogue for output tile j of layer l: bias + residual relu(x).
        y = (acc_ref[...] + b_ref[...].astype(jnp.float32)
             + jnp.maximum(h_in[j], 0.0))
        h_out[j] = y

        @pl.when(j == nj - 1)
        def _():
            # Layer finished: promote h_out -> h_in for the next layer.
            h_in[...] = h_out[...]

            @pl.when(l == nl - 1)
            def _():
                for t in range(nt):
                    o_ref[:, t * tile:(t + 1) * tile] = \
                        h_out[t].astype(o_ref.dtype)


def pallas_residual_stack(h0, w_stack, b_stack, *, tile):
    """h0: (M, H) f32; w_stack: (L, H, H) bf16; b_stack: (L, 1, H) f32."""
    M, H = h0.shape
    L, Hk, Hn = w_stack.shape
    assert Hk == H and Hn == H and b_stack.shape == (L, 1, H)
    assert M % 8 == 0 and H % tile == 0
    nt = H // tile

    cost = pl.CostEstimate(
        flops=2 * M * H * H * L,
        transcendentals=0,
        bytes_accessed=int(L * H * H * w_stack.dtype.itemsize
                           + L * H * 4 + 2 * M * H * 4))

    return pl.pallas_call(
        functools.partial(_residual_stack_kernel, tile=tile, nt=nt),
        out_shape=jax.ShapeDtypeStruct((M, H), jnp.float32),
        grid_spec=pltpu.PrefetchScalarGridSpec(
            num_scalar_prefetch=0,
            grid=(L, nt, nt),                       # (layer, N tiles, K tiles)
            in_specs=[
                pl.BlockSpec((M, H), lambda l, j, k: (0, 0)),           # h0 resident
                pl.BlockSpec((None, tile, tile), lambda l, j, k: (l, k, j)),
                pl.BlockSpec((None, 1, tile), lambda l, j, k: (l, 0, j)),
            ],
            out_specs=pl.BlockSpec((M, H), lambda l, j, k: (0, 0)),     # resident
            scratch_shapes=[
                pltpu.VMEM((nt, M, tile), jnp.float32),   # h_in  (layer input)
                pltpu.VMEM((nt, M, tile), jnp.float32),   # h_out (layer output)
                pltpu.VMEM((M, tile), jnp.float32),       # f32 accumulator
            ],
        ),
        compiler_params=pltpu.CompilerParams(
            # Layer & K axes carry sequential deps through the VMEM-resident
            # activation -> keep the whole stack on one core.
            dimension_semantics=("arbitrary", "arbitrary", "arbitrary")),
        cost_estimate=cost,
    )(h0, w_stack, b_stack)


# ----------------------------------------------------------------------------
# Parameters (PyTorch-Linear-style uniform init; weights bf16, biases f32)
# ----------------------------------------------------------------------------
def make_linear_params(key, fan_in, fan_out, w_dtype=jnp.bfloat16):
    kw, kb = jax.random.split(key)
    bound = 1.0 / (fan_in ** 0.5)
    # Stored as (in, out) == W.T relative to PyTorch's (out, in).
    w = jax.random.uniform(kw, (fan_in, fan_out), jnp.float32, -bound, bound)
    b = jax.random.uniform(kb, (1, fan_out), jnp.float32, -bound, bound)
    return w.astype(w_dtype), b


def init_feedforward(key, in_dim, hidden_dim, out_dim, n_residual=7,
                     w_dtype=jnp.bfloat16):
    keys = jax.random.split(key, n_residual + 2)
    params = [make_linear_params(keys[0], in_dim, hidden_dim, w_dtype)]
    for i in range(n_residual):
        params.append(make_linear_params(keys[1 + i], hidden_dim, hidden_dim,
                                          w_dtype))
    params.append(make_linear_params(keys[-1], hidden_dim, out_dim, w_dtype))
    return params


def pack_feedforward_params(params, *, tile_cap=1024):
    """Pad & stack weights ONCE, outside the jitted forward, so no per-call
    padding/stacking traffic over the ~2 GB weight set."""
    w0, b0 = params[0]
    wN, bN = params[-1]
    res = params[1:-1]
    in_dim, hidden = w0.shape
    out_dim = wN.shape[1]

    _, in_p = _tile_and_pad(in_dim, tile_cap)
    _, hid_p = _tile_and_pad(hidden, tile_cap)
    _, out_p = _tile_and_pad(out_dim, tile_cap)

    return {
        "w0": _pad2d(w0, in_p, hid_p), "b0": _pad2d(b0, 1, hid_p),
        "wN": _pad2d(wN, hid_p, out_p), "bN": _pad2d(bN, 1, out_p),
        "w_stack": (jnp.stack([_pad2d(w, hid_p, hid_p) for w, _ in res])
                    if res else None),
        "b_stack": (jnp.stack([_pad2d(b, 1, hid_p) for _, b in res])
                    if res else None),
    }


# ----------------------------------------------------------------------------
# Forward pass
# ----------------------------------------------------------------------------
def feedforward_pallas(packed, x, *, out_dim, tile_cap=1024):
    batch, _ = x.shape
    in_p, hid_p = packed["w0"].shape
    out_p = packed["wN"].shape[1]

    tk_in = min(in_p, tile_cap)
    t_hid = min(hid_p, tile_cap)
    t_out = min(out_p, tile_cap)
    m_p = _round_up(batch, 8)

    # Zero-pad the activation; padded lanes are inert through matmul/bias/relu
    # so the result is exact after the final slice.
    x_p = _pad2d(x, m_p, in_p)

    h = pallas_linear(x_p, packed["w0"], packed["b0"], apply_relu=True,
                      tk=tk_in, tn=t_hid)
    if packed["w_stack"] is not None:
        h = pallas_residual_stack(h, packed["w_stack"], packed["b_stack"],
                                  tile=t_hid)
    y = pallas_linear(h, packed["wN"], packed["bN"], apply_relu=False,
                      tk=t_hid, tn=t_out)
    return y[:batch, :out_dim]


# Pure-JAX reference (same dtype policy: bf16 weights, f32 accumulation).
def feedforward_ref(params, x):
    def lin(h, w, b):
        return (jnp.dot(h.astype(w.dtype), w,
                        preferred_element_type=jnp.float32)
                + b.astype(jnp.float32))
    w0, b0 = params[0]
    h = jnp.maximum(lin(x, w0, b0), 0.0)
    for w, b in params[1:-1]:
        h = lin(h, w, b) + jnp.maximum(h, 0.0)
    wN, bN = params[-1]
    return lin(h, wN, bN)


# ----------------------------------------------------------------------------
if __name__ == "__main__":
    # Small, deliberately NON-lane-aligned stand-ins for the real module dims
    # (in=4000, hidden=12000, out=221); tile_cap=128 so the multi-tile grids,
    # padding, and the fused 7-layer residual stack are all exercised.
    batch, in_dim, hidden_dim, out_dim = 6, 200, 300, 100
    n_residual = 7
    tile_cap = 128

    key = jax.random.PRNGKey(0)
    kx, kp = jax.random.split(key)
    x = jax.random.normal(kx, (batch, in_dim), dtype=jnp.float32)
    params = init_feedforward(kp, in_dim, hidden_dim, out_dim,
                              n_residual=n_residual)

    packed = pack_feedforward_params(params, tile_cap=tile_cap)
    fwd = jax.jit(functools.partial(feedforward_pallas, out_dim=out_dim,
                                    tile_cap=tile_cap))
    out = jax.block_until_ready(fwd(packed, x))

    ref = feedforward_ref(params, x)
    assert out.shape == (batch, out_dim), out.shape
    max_err = float(jnp.max(jnp.abs(out - ref)))
    assert jnp.allclose(out, ref, atol=5e-3, rtol=5e-3), max_err

    print("KERNEL_OK")
</pallas_src>

<mosaic_0001>
module attributes {stable_mosaic.version = 11 : i64} {
  func.func @_linear_kernel(%arg0: i32, %arg1: i32, %arg2: memref<8x128xf32, #tpu.memory_space<vmem>>, %arg3: memref<128x128xbf16, #tpu.memory_space<vmem>>, %arg4: memref<1x128xf32, #tpu.memory_space<vmem>>, %arg5: memref<8x128xf32, #tpu.memory_space<vmem>>, %arg6: memref<8x128xf32, #tpu.memory_space<vmem>>) attributes {dimension_semantics = [#tpu.dimension_semantics<parallel>, #tpu.dimension_semantics<arbitrary>], iteration_bounds = array<i64: 3, 2>, scalar_prefetch = 0 : i64, scratch_operands = 1 : i64, tpu.core_type = #tpu.core_type<tc>, window_params = [{transform_indices = @transform_0, window_bounds = array<i64: 8, 128>}, {transform_indices = @transform_1, window_bounds = array<i64: 128, 128>}, {transform_indices = @transform_2, window_bounds = array<i64: 1, 128>}, {transform_indices = @transform_3, window_bounds = array<i64: 8, 128>}]} {
    %c0_i32 = arith.constant 0 : i32
    %0 = arith.cmpi eq, %arg1, %c0_i32 : i32
    %1 = arith.extui %0 : i1 to i32
    %c0_i32_0 = arith.constant 0 : i32
    %2 = arith.cmpi ne, %1, %c0_i32_0 : i32
    scf.if %2 {
      %cst_9 = arith.constant 0.000000e+00 : f32
      %13 = vector.broadcast %cst_9 : f32 to vector<8x128xf32>
      %c0_10 = arith.constant 0 : index
      %c0_11 = arith.constant 0 : index
      %14 = vector.load %arg6[%c0_10, %c0_11] : memref<8x128xf32, #tpu.memory_space<vmem>>, vector<8x128xf32>
      tpu.vector_store %arg6[%c0_10, %c0_11], %13 {strides = array<i32>} : memref<8x128xf32, #tpu.memory_space<vmem>>, vector<8x128xf32>,
    } else {
    }
    %c0 = arith.constant 0 : index
    %c0_1 = arith.constant 0 : index
    %3 = vector.load %arg3[%c0, %c0_1] : memref<128x128xbf16, #tpu.memory_space<vmem>>, vector<128x128xbf16>
    %c0_2 = arith.constant 0 : index
    %c0_3 = arith.constant 0 : index
    %4 = vector.load %arg6[%c0_2, %c0_3] : memref<8x128xf32, #tpu.memory_space<vmem>>, vector<8x128xf32>
    %c0_4 = arith.constant 0 : index
    %c0_5 = arith.constant 0 : index
    %5 = vector.load %arg2[%c0_4, %c0_5] : memref<8x128xf32, #tpu.memory_space<vmem>>, vector<8x128xf32>
    %6 = arith.truncf %5 : vector<8x128xf32> to vector<8x128xbf16>
    %cst = arith.constant dense<0.000000e+00> : vector<8x128xf32>
    %7 = tpu.matmul %6, %3, %cst {dimension_numbers = #tpu.dot_dimension_numbers<[1], [0], [0], [1], [0, 0, 1, 1], [], []>} : vector<8x128xbf16>, vector<128x128xbf16>, vector<8x128xf32> -> vector<8x128xf32>
    %8 = arith.addf %4, %7 : vector<8x128xf32>
    %c0_6 = arith.constant 0 : index
    %c0_7 = arith.constant 0 : index
    %9 = vector.load %arg6[%c0_6, %c0_7] : memref<8x128xf32, #tpu.memory_space<vmem>>, vector<8x128xf32>
    tpu.vector_store %arg6[%c0_6, %c0_7], %8 {strides = array<i32>} : memref<8x128xf32, #tpu.memory_space<vmem>>, vector<8x128xf32>,
    %c1_i32 = arith.constant 1 : i32
    %10 = arith.cmpi eq, %arg1, %c1_i32 : i32
    %11 = arith.extui %10 : i1 to i32
    %c0_i32_8 = arith.constant 0 : i32
    %12 = arith.cmpi ne, %11, %c0_i32_8 : i32
    scf.if %12 {
      %c0_9 = arith.constant 0 : index
      %c0_10 = arith.constant 0 : index
      %13 = vector.load %arg6[%c0_9, %c0_10] : memref<8x128xf32, #tpu.memory_space<vmem>>, vector<8x128xf32>
      %c0_11 = arith.constant 0 : index
      %c0_12 = arith.constant 0 : index
      %14 = vector.load %arg4[%c0_11, %c0_12] : memref<1x128xf32, #tpu.memory_space<vmem>>, vector<1x128xf32>
      %15 = vector.broadcast %14 : vector<1x128xf32> to vector<8x128xf32>
      %16 = arith.addf %13, %15 : vector<8x128xf32>
      %cst_13 = arith.constant 0.000000e+00 : f32
      %17 = vector.broadcast %cst_13 : f32 to vector<8x128xf32>
      %18 = arith.maximumf %16, %17 : vector<8x128xf32>
      %c0_14 = arith.constant 0 : index
      %c0_15 = arith.constant 0 : index
      %19 = vector.load %arg5[%c0_14, %c0_15] : memref<8x128xf32, #tpu.memory_space<vmem>>, vector<8x128xf32>
      tpu.vector_store %arg5[%c0_14, %c0_15], %18 {strides = array<i32>} : memref<8x128xf32, #tpu.memory_space<vmem>>, vector<8x128xf32>,
    } else {
    }
    return
  }
  func.func @transform_0(%arg0: i32, %arg1: i32) -> (i32, i32) {
    %c0_i32 = arith.constant 0 : i32
    %c0_i32_0 = arith.constant 0 : i32
    return %c0_i32, %arg1 : i32, i32
  }
  func.func @transform_1(%arg0: i32, %arg1: i32) -> (i32, i32) {
    %c0_i32 = arith.constant 0 : i32
    return %arg1, %arg0 : i32, i32
  }
  func.func @transform_2(%arg0: i32, %arg1: i32) -> (i32, i32) {
    %c0_i32 = arith.constant 0 : i32
    %c0_i32_0 = arith.constant 0 : i32
    return %c0_i32, %arg0 : i32, i32
  }
  func.func @transform_3(%arg0: i32, %arg1: i32) -> (i32, i32) {
    %c0_i32 = arith.constant 0 : i32
    %c0_i32_0 = arith.constant 0 : i32
    return %c0_i32, %arg0 : i32, i32
  }
}

module attributes {stable_mosaic.version = 11 : i64} {
  func.func @_residual_stack_kernel(%arg0: i32, %arg1: i32, %arg2: i32, %arg3: memref<8x384xf32, #tpu.memory_space<vmem>>, %arg4: memref<1x128x128xbf16, #tpu.memory_space<vmem>>, %arg5: memref<1x1x128xf32, #tpu.memory_space<vmem>>, %arg6: memref<8x384xf32, #tpu.memory_space<vmem>>, %arg7: memref<3x8x128xf32, #tpu.memory_space<vmem>>, %arg8: memref<3x8x128xf32, #tpu.memory_space<vmem>>, %arg9: memref<8x128xf32, #tpu.memory_space<vmem>>) attributes {dimension_semantics = [#tpu.dimension_semantics<arbitrary>, #tpu.dimension_semantics<arbitrary>, #tpu.dimension_semantics<arbitrary>], iteration_bounds = array<i64: 7, 3, 3>, scalar_prefetch = 0 : i64, scratch_operands = 3 : i64, tpu.core_type = #tpu.core_type<tc>, window_params = [{pipeline_mode = #tpu.pipeline_mode<synchronous>, transform_indices = @transform_0, window_bounds = array<i64: 8, 384>}, {transform_indices = @transform_1, window_bounds = array<i64: 1, 128, 128>}, {transform_indices = @transform_2, window_bounds = array<i64: 1, 1, 128>}, {pipeline_mode = #tpu.pipeline_mode<synchronous>, transform_indices = @transform_3, window_bounds = array<i64: 8, 384>}]} {
    %c0_i32 = arith.constant 0 : i32
    %0 = arith.cmpi eq, %arg0, %c0_i32 : i32
    %c0_i32_0 = arith.constant 0 : i32
    %1 = arith.cmpi eq, %arg1, %c0_i32_0 : i32
    %2 = arith.andi %0, %1 : i1
    %c0_i32_1 = arith.constant 0 : i32
    %3 = arith.cmpi eq, %arg2, %c0_i32_1 : i32
    %4 = arith.andi %2, %3 : i1
    %5 = arith.extui %4 : i1 to i32
    %c0_i32_2 = arith.constant 0 : i32
    %6 = arith.cmpi ne, %5, %c0_i32_2 : i32
    scf.if %6 {
      %c0_14 = arith.constant 0 : index
      %c0_15 = arith.constant 0 : index
      %23 = vector.load %arg3[%c0_14, %c0_15] : memref<8x384xf32, #tpu.memory_space<vmem>>, vector<8x128xf32>
      %c0_16 = arith.constant 0 : index
      %c0_17 = arith.constant 0 : index
      %c0_18 = arith.constant 0 : index
      %24 = vector.load %arg7[%c0_16, %c0_17, %c0_18] : memref<3x8x128xf32, #tpu.memory_space<vmem>>, vector<1x8x128xf32>
      %25 = vector.shape_cast %24 : vector<1x8x128xf32> to vector<8x128xf32>
      %26 = vector.shape_cast %23 : vector<8x128xf32> to vector<1x8x128xf32>
      tpu.vector_store %arg7[%c0_16, %c0_17, %c0_18], %26 {strides = array<i32>} : memref<3x8x128xf32, #tpu.memory_space<vmem>>, vector<1x8x128xf32>,
      %c0_19 = arith.constant 0 : index
      %c128 = arith.constant 128 : index
      %27 = vector.load %arg3[%c0_19, %c128] : memref<8x384xf32, #tpu.memory_space<vmem>>, vector<8x128xf32>
      %c1 = arith.constant 1 : index
      %c0_20 = arith.constant 0 : index
      %c0_21 = arith.constant 0 : index
      %28 = vector.load %arg7[%c1, %c0_20, %c0_21] : memref<3x8x128xf32, #tpu.memory_space<vmem>>, vector<1x8x128xf32>
      %29 = vector.shape_cast %28 : vector<1x8x128xf32> to vector<8x128xf32>
      %30 = vector.shape_cast %27 : vector<8x128xf32> to vector<1x8x128xf32>
      tpu.vector_store %arg7[%c1, %c0_20, %c0_21], %30 {strides = array<i32>} : memref<3x8x128xf32, #tpu.memory_space<vmem>>, vector<1x8x128xf32>,
      %c0_22 = arith.constant 0 : index
      %c256 = arith.constant 256 : index
      %31 = vector.load %arg3[%c0_22, %c256] : memref<8x384xf32, #tpu.memory_space<vmem>>, vector<8x128xf32>
      %c2 = arith.constant 2 : index
      %c0_23 = arith.constant 0 : index
      %c0_24 = arith.constant 0 : index
      %32 = vector.load %arg7[%c2, %c0_23, %c0_24] : memref<3x8x128xf32, #tpu.memory_space<vmem>>, vector<1x8x128xf32>
      %33 = vector.shape_cast %32 : vector<1x8x128xf32> to vector<8x128xf32>
      %34 = vector.shape_cast %31 : vector<8x128xf32> to vector<1x8x128xf32>
      tpu.vector_store %arg7[%c2, %c0_23, %c0_24], %34 {strides = array<i32>} : memref<3x8x128xf32, #tpu.memory_space<vmem>>, vector<1x8x128xf32>,
    } else {
    }
    %c0_i32_3 = arith.constant 0 : i32
    %7 = arith.cmpi eq, %arg2, %c0_i32_3 : i32
    %8 = arith.extui %7 : i1 to i32
    %c0_i32_4 = arith.constant 0 : i32
    %9 = arith.cmpi ne, %8, %c0_i32_4 : i32
    scf.if %9 {
      %cst_14 = arith.constant 0.000000e+00 : f32
      %23 = vector.broadcast %cst_14 : f32 to vector<8x128xf32>
      %c0_15 = arith.constant 0 : index
      %c0_16 = arith.constant 0 : index
      %24 = vector.load %arg9[%c0_15, %c0_16] : memref<8x128xf32, #tpu.memory_space<vmem>>, vector<8x128xf32>
      tpu.vector_store %arg9[%c0_15, %c0_16], %23 {strides = array<i32>} : memref<8x128xf32, #tpu.memory_space<vmem>>, vector<8x128xf32>,
    } else {
    }
    %c0 = arith.constant 0 : index
    %c0_5 = arith.constant 0 : index
    %c0_6 = arith.constant 0 : index
    %10 = vector.load %arg4[%c0, %c0_5, %c0_6] : memref<1x128x128xbf16, #tpu.memory_space<vmem>>, vector<1x128x128xbf16>
    %11 = vector.shape_cast %10 : vector<1x128x128xbf16> to vector<128x128xbf16>
    %c0_7 = arith.constant 0 : index
    %c0_8 = arith.constant 0 : index
    %12 = vector.load %arg9[%c0_7, %c0_8] : memref<8x128xf32, #tpu.memory_space<vmem>>, vector<8x128xf32>
    %13 = arith.index_cast %arg2 : i32 to index
    %c0_9 = arith.constant 0 : index
    %c0_10 = arith.constant 0 : index
    %14 = vector.load %arg7[%13, %c0_9, %c0_10] : memref<3x8x128xf32, #tpu.memory_space<vmem>>, vector<1x8x128xf32>
    %15 = vector.shape_cast %14 : vector<1x8x128xf32> to vector<8x128xf32>
    %16 = arith.truncf %15 : vector<8x128xf32> to vector<8x128xbf16>
    %cst = arith.constant dense<0.000000e+00> : vector<8x128xf32>
    %17 = tpu.matmul %16, %11, %cst {dimension_numbers = #tpu.dot_dimension_numbers<[1], [0], [0], [1], [0, 0, 1, 1], [], []>} : vector<8x128xbf16>, vector<128x128xbf16>, vector<8x128xf32> -> vector<8x128xf32>
    %18 = arith.addf %12, %17 : vector<8x128xf32>
    %c0_11 = arith.constant 0 : index
    %c0_12 = arith.constant 0 : index
    %19 = vector.load %arg9[%c0_11, %c0_12] : memref<8x128xf32, #tpu.memory_space<vmem>>, vector<8x128xf32>
    tpu.vector_store %arg9[%c0_11, %c0_12], %18 {strides = array<i32>} : memref<8x128xf32, #tpu.memory_space<vmem>>, vector<8x128xf32>,
    %c2_i32 = arith.constant 2 : i32
    %20 = arith.cmpi eq, %arg2, %c2_i32 : i32
    %21 = arith.extui %20 : i1 to i32
    %c0_i32_13 = arith.constant 0 : i32
    %22 = arith.cmpi ne, %21, %c0_i32_13 : i32
    scf.if %22 {
      %c0_14 = arith.constant 0 : index
      %c0_15 = arith.constant 0 : index
      %23 = vector.load %arg9[%c0_14, %c0_15] : memref<8x128xf32, #tpu.memory_space<vmem>>, vector<8x128xf32>
      %c0_16 = arith.constant 0 : index
      %c0_17 = arith.constant 0 : index
      %c0_18 = arith.constant 0 : index
      %24 = vector.load %arg5[%c0_16, %c0_17, %c0_18] : memref<1x1x128xf32, #tpu.memory_space<vmem>>, vector<1x1x128xf32>
      %25 = vector.shape_cast %24 : vector<1x1x128xf32> to vector<1x128xf32>
      %26 = vector.broadcast %25 : vector<1x128xf32> to vector<8x128xf32>
      %27 = arith.addf %23, %26 : vector<8x128xf32>
      %28 = arith.index_cast %arg1 : i32 to index
      %c0_19 = arith.constant 0 : index
      %c0_20 = arith.constant 0 : index
      %29 = vector.load %arg7[%28, %c0_19, %c0_20] : memref<3x8x128xf32, #tpu.memory_space<vmem>>, vector<1x8x128xf32>
      %30 = vector.shape_cast %29 : vector<1x8x128xf32> to vector<8x128xf32>
      %cst_21 = arith.constant 0.000000e+00 : f32
      %31 = vector.broadcast %cst_21 : f32 to vector<8x128xf32>
      %32 = arith.maximumf %30, %31 : vector<8x128xf32>
      %33 = arith.addf %27, %32 : vector<8x128xf32>
      %34 = arith.index_cast %arg1 : i32 to index
      %c0_22 = arith.constant 0 : index
      %c0_23 = arith.constant 0 : index
      %35 = vector.load %arg8[%34, %c0_22, %c0_23] : memref<3x8x128xf32, #tpu.memory_space<vmem>>, vector<1x8x128xf32>
      %36 = vector.shape_cast %35 : vector<1x8x128xf32> to vector<8x128xf32>
      %37 = vector.shape_cast %33 : vector<8x128xf32> to vector<1x8x128xf32>
      tpu.vector_store %arg8[%34, %c0_22, %c0_23], %37 {strides = array<i32>} : memref<3x8x128xf32, #tpu.memory_space<vmem>>, vector<1x8x128xf32>,
      %c2_i32_24 = arith.constant 2 : i32
      %38 = arith.cmpi eq, %arg1, %c2_i32_24 : i32
      %39 = arith.extui %38 : i1 to i32
      %c0_i32_25 = arith.constant 0 : i32
      %40 = arith.cmpi ne, %39, %c0_i32_25 : i32
      scf.if %40 {
        %c0_26 = arith.constant 0 : index
        %c0_27 = arith.constant 0 : index
        %c0_28 = arith.constant 0 : index
        %41 = vector.load %arg8[%c0_26, %c0_27, %c0_28] : memref<3x8x128xf32, #tpu.memory_space<vmem>>, vector<3x8x128xf32>
        %c0_29 = arith.constant 0 : index
        %c0_30 = arith.constant 0 : index
        %c0_31 = arith.constant 0 : index
        %42 = vector.load %arg7[%c0_29, %c0_30, %c0_31] : memref<3x8x128xf32, #tpu.memory_space<vmem>>, vector<3x8x128xf32>
        tpu.vector_store %arg7[%c0_29, %c0_30, %c0_31], %41 {strides = array<i32>} : memref<3x8x128xf32, #tpu.memory_space<vmem>>, vector<3x8x128xf32>,
        %c6_i32 = arith.constant 6 : i32
        %43 = arith.cmpi eq, %arg0, %c6_i32 : i32
        %44 = arith.extui %43 : i1 to i32
        %c0_i32_32 = arith.constant 0 : i32
        %45 = arith.cmpi ne, %44, %c0_i32_32 : i32
        scf.if %45 {
          %c0_33 = arith.constant 0 : index
          %c0_34 = arith.constant 0 : index
          %c0_35 = arith.constant 0 : index
          %46 = vector.load %arg8[%c0_33, %c0_34, %c0_35] : memref<3x8x128xf32, #tpu.memory_space<vmem>>, vector<1x8x128xf32>
          %47 = vector.shape_cast %46 : vector<1x8x128xf32> to vector<8x128xf32>
          %c0_36 = arith.constant 0 : index
          %c0_37 = arith.constant 0 : index
          %48 = vector.load %arg6[%c0_36, %c0_37] : memref<8x384xf32, #tpu.memory_space<vmem>>, vector<8x128xf32>
          tpu.vector_store %arg6[%c0_36, %c0_37], %47 {strides = array<i32>} : memref<8x384xf32, #tpu.memory_space<vmem>>, vector<8x128xf32>,
          %c1 = arith.constant 1 : index
          %c0_38 = arith.constant 0 : index
          %c0_39 = arith.constant 0 : index
          %49 = vector.load %arg8[%c1, %c0_38, %c0_39] : memref<3x8x128xf32, #tpu.memory_space<vmem>>, vector<1x8x128xf32>
          %50 = vector.shape_cast %49 : vector<1x8x128xf32> to vector<8x128xf32>
          %c0_40 = arith.constant 0 : index
          %c128 = arith.constant 128 : index
          %51 = vector.load %arg6[%c0_40, %c128] : memref<8x384xf32, #tpu.memory_space<vmem>>, vector<8x128xf32>
          tpu.vector_store %arg6[%c0_40, %c128], %50 {strides = array<i32>} : memref<8x384xf32, #tpu.memory_space<vmem>>, vector<8x128xf32>,
          %c2 = arith.constant 2 : index
          %c0_41 = arith.constant 0 : index
          %c0_42 = arith.constant 0 : index
          %52 = vector.load %arg8[%c2, %c0_41, %c0_42] : memref<3x8x128xf32, #tpu.memory_space<vmem>>, vector<1x8x128xf32>
          %53 = vector.shape_cast %52 : vector<1x8x128xf32> to vector<8x128xf32>
          %c0_43 = arith.constant 0 : index
          %c256 = arith.constant 256 : index
          %54 = vector.load %arg6[%c0_43, %c256] : memref<8x384xf32, #tpu.memory_space<vmem>>, vector<8x128xf32>
          tpu.vector_store %arg6[%c0_43, %c256], %53 {strides = array<i32>} : memref<8x384xf32, #tpu.memory_space<vmem>>, vector<8x128xf32>,
        } else {
        }
      } else {
      }
    } else {
    }
    return
  }
  func.func @transform_0(%arg0: i32, %arg1: i32, %arg2: i32) -> (i32, i32) {
    %c0_i32 = arith.constant 0 : i32
    %c0_i32_0 = arith.constant 0 : i32
    %c0_i32_1 = arith.constant 0 : i32
    return %c0_i32, %c0_i32_0 : i32, i32
  }
  func.func @transform_1(%arg0: i32, %arg1: i32, %arg2: i32) -> (i32, i32, i32) {
    %c0_i32 = arith.constant 0 : i32
    return %arg0, %arg2, %arg1 : i32, i32, i32
  }
  func.func @transform_2(%arg0: i32, %arg1: i32, %arg2: i32) -> (i32, i32, i32) {
    %c0_i32 = arith.constant 0 : i32
    %c0_i32_0 = arith.constant 0 : i32
    return %arg0, %c0_i32, %arg1 : i32, i32, i32
  }
  func.func @transform_3(%arg0: i32, %arg1: i32, %arg2: i32) -> (i32, i32) {
    %c0_i32 = arith.constant 0 : i32
    %c0_i32_0 = arith.constant 0 : i32
    %c0_i32_1 = arith.constant 0 : i32
    return %c0_i32, %c0_i32_0 : i32, i32
  }
}

module attributes {stable_mosaic.version = 11 : i64} {
  func.func @_linear_kernel(%arg0: i32, %arg1: i32, %arg2: memref<8x128xf32, #tpu.memory_space<vmem>>, %arg3: memref<128x128xbf16, #tpu.memory_space<vmem>>, %arg4: memref<1x128xf32, #tpu.memory_space<vmem>>, %arg5: memref<8x128xf32, #tpu.memory_space<vmem>>, %arg6: memref<8x128xf32, #tpu.memory_space<vmem>>) attributes {dimension_semantics = [#tpu.dimension_semantics<parallel>, #tpu.dimension_semantics<arbitrary>], iteration_bounds = array<i64: 1, 3>, scalar_prefetch = 0 : i64, scratch_operands = 1 : i64, tpu.core_type = #tpu.core_type<tc>, window_params = [{transform_indices = @transform_0, window_bounds = array<i64: 8, 128>}, {transform_indices = @transform_1, window_bounds = array<i64: 128, 128>}, {transform_indices = @transform_2, window_bounds = array<i64: 1, 128>}, {transform_indices = @transform_3, window_bounds = array<i64: 8, 128>}]} {
    %c0_i32 = arith.constant 0 : i32
    %0 = arith.cmpi eq, %arg1, %c0_i32 : i32
    %1 = arith.extui %0 : i1 to i32
    %c0_i32_0 = arith.constant 0 : i32
    %2 = arith.cmpi ne, %1, %c0_i32_0 : i32
    scf.if %2 {
      %cst_9 = arith.constant 0.000000e+00 : f32
      %13 = vector.broadcast %cst_9 : f32 to vector<8x128xf32>
      %c0_10 = arith.constant 0 : index
      %c0_11 = arith.constant 0 : index
      %14 = vector.load %arg6[%c0_10, %c0_11] : memref<8x128xf32, #tpu.memory_space<vmem>>, vector<8x128xf32>
      tpu.vector_store %arg6[%c0_10, %c0_11], %13 {strides = array<i32>} : memref<8x128xf32, #tpu.memory_space<vmem>>, vector<8x128xf32>,
    } else {
    }
    %c0 = arith.constant 0 : index
    %c0_1 = arith.constant 0 : index
    %3 = vector.load %arg3[%c0, %c0_1] : memref<128x128xbf16, #tpu.memory_space<vmem>>, vector<128x128xbf16>
    %c0_2 = arith.constant 0 : index
    %c0_3 = arith.constant 0 : index
    %4 = vector.load %arg6[%c0_2, %c0_3] : memref<8x128xf32, #tpu.memory_space<vmem>>, vector<8x128xf32>
    %c0_4 = arith.constant 0 : index
    %c0_5 = arith.constant 0 : index
    %5 = vector.load %arg2[%c0_4, %c0_5] : memref<8x128xf32, #tpu.memory_space<vmem>>, vector<8x128xf32>
    %6 = arith.truncf %5 : vector<8x128xf32> to vector<8x128xbf16>
    %cst = arith.constant dense<0.000000e+00> : vector<8x128xf32>
    %7 = tpu.matmul %6, %3, %cst {dimension_numbers = #tpu.dot_dimension_numbers<[1], [0], [0], [1], [0, 0, 1, 1], [], []>} : vector<8x128xbf16>, vector<128x128xbf16>, vector<8x128xf32> -> vector<8x128xf32>
    %8 = arith.addf %4, %7 : vector<8x128xf32>
    %c0_6 = arith.constant 0 : index
    %c0_7 = arith.constant 0 : index
    %9 = vector.load %arg6[%c0_6, %c0_7] : memref<8x128xf32, #tpu.memory_space<vmem>>, vector<8x128xf32>
    tpu.vector_store %arg6[%c0_6, %c0_7], %8 {strides = array<i32>} : memref<8x128xf32, #tpu.memory_space<vmem>>, vector<8x128xf32>,
    %c2_i32 = arith.constant 2 : i32
    %10 = arith.cmpi eq, %arg1, %c2_i32 : i32
    %11 = arith.extui %10 : i1 to i32
    %c0_i32_8 = arith.constant 0 : i32
    %12 = arith.cmpi ne, %11, %c0_i32_8 : i32
    scf.if %12 {
      %c0_9 = arith.constant 0 : index
      %c0_10 = arith.constant 0 : index
      %13 = vector.load %arg6[%c0_9, %c0_10] : memref<8x128xf32, #tpu.memory_space<vmem>>, vector<8x128xf32>
      %c0_11 = arith.constant 0 : index
      %c0_12 = arith.constant 0 : index
      %14 = vector.load %arg4[%c0_11, %c0_12] : memref<1x128xf32, #tpu.memory_space<vmem>>, vector<1x128xf32>
      %15 = vector.broadcast %14 : vector<1x128xf32> to vector<8x128xf32>
      %16 = arith.addf %13, %15 : vector<8x128xf32>
      %c0_13 = arith.constant 0 : index
      %c0_14 = arith.constant 0 : index
      %17 = vector.load %arg5[%c0_13, %c0_14] : memref<8x128xf32, #tpu.memory_space<vmem>>, vector<8x128xf32>
      tpu.vector_store %arg5[%c0_13, %c0_14], %16 {strides = array<i32>} : memref<8x128xf32, #tpu.memory_space<vmem>>, vector<8x128xf32>,
    } else {
    }
    return
  }
  func.func @transform_0(%arg0: i32, %arg1: i32) -> (i32, i32) {
    %c0_i32 = arith.constant 0 : i32
    %c0_i32_0 = arith.constant 0 : i32
    return %c0_i32, %arg1 : i32, i32
  }
  func.func @transform_1(%arg0: i32, %arg1: i32) -> (i32, i32) {
    %c0_i32 = arith.constant 0 : i32
    return %arg1, %arg0 : i32, i32
  }
  func.func @transform_2(%arg0: i32, %arg1: i32) -> (i32, i32) {
    %c0_i32 = arith.constant 0 : i32
    %c0_i32_0 = arith.constant 0 : i32
    return %c0_i32, %arg0 : i32, i32
  }
  func.func @transform_3(%arg0: i32, %arg1: i32) -> (i32, i32) {
    %c0_i32 = arith.constant 0 : i32
    %c0_i32_0 = arith.constant 0 : i32
    return %c0_i32, %arg0 : i32, i32
  }
}

</mosaic_0001>

<bundles_post_ra>
// kernel: feedforward_pallas.5
= control target key start
LH: loop header
LB: loop body
LE: loop exit
PB: predicated region body
PF: predicated region fallthrough
CT: control target
= control target key end

     0   :  { %8 = vsyncpa [#allocation4], 0  ;;  %s569_s12 = smov 0   ;;  %s571_s13 = smov 0   ;;  %s618_s0 = inlined_call_operand.vmem [shape: f32[8,384], index: 0, kind: input, shape index: {}]   ;;  %s619_s1 = inlined_call_operand.vmem [shape: bf16[384,128], index: 1, kind: input, shape index: {}]   ;;  %s620_s2 = inlined_call_operand.vmem [shape: f32[1,128], index: 2, kind: input, shape index: {}]   ;;  %s621_s3 = inlined_call_operand.hbm [shape: f32[8,128], index: 3, kind: output, shape index: {}]  }
   0x1   :  { %s573_s14 = smov 0  }
   0x2 LB: > { %s404_s15 = sadd.s32 4294967295, %s545_s14   ;;  %s23_s16 = sadd.s32 1, %s541_s13  ;;  %s545_s14 = sphi %s573_s14, %s14_s14   ;;  %s541_s13 = sphi %s571_s13, %s623_s13   ;;  %s537_s12 = sphi %s569_s12, %s622_s12  }
   0x3   : > { %p24_p0 = scmp.ge.s32.totalorder %s23_s16, 3  ;;  %p408_p1 = scmp.ge.s32.totalorder %s545_s14, 1 }
   0x4   : > { %p173_p2 = scmp.lt.s32.totalorder %s545_s14, 4 }
   0x5   : > { %s625_s16 = smov (%p24_p0, %s23_s16), 0 }
   0x6   : > { %p174_p3 = pnand %p408_p1, %p173_p2 }
   0x7   : > { %p202_p4 = scmp.lt.s32.totalorder (!%p174_p3), %s537_s12, 2  ;;  %s410_s17 = sshll.u32 (!%p174_p3), %s537_s12, 4 }
   0x8   : > { %177 = sbr.rel (%p174_p3) target bundleno = 198 (0xc6), region = 32  ;;  %p207_p5 = scmp.lt.s32.totalorder (!%p174_p3), %s410_s17, 47 }
   0x9   : > { %p412_p6 = scmp.ne.s32.totalorder (!%p174_p3), %s537_s12, 0 }
   0xd   : > { %s203_s18 = scalar_select %p202_p4, %s537_s12, 2 }
   0xe   : > { %s627_s17 = smov (!%p207_p5, %s410_s17), 47  ;;  %221 = sbr.rel (%p412_p6) target bundleno = 21 (0x15), region = 36 }
   0xf   : > { %s409_s19 = sshll.u32 %s203_s18, 3  ;;  %s411_s23 = sshll.u32 %s627_s17, 2 }
  0x10   : > { %s205_s22 = scalar_lea.vmem %s618_s0, %s409_s19  ;;  %s213_s26 = scalar_lea.vmem %s619_s1, %s411_s23 }
  0x13   : > { %v547_v0 = vmov 0.0  }
  0x14   : > { %222 = vst [vmem:[#allocation2] sm:$0xff] %v547_v0 }
  0x15 PF: > { %v457_v1 = vld [vmem:[%s213_s26 + $0x38] sm:$0xff]  ;;  %v456_v2 = vld [vmem:[%s213_s26 + $0x30] sm:$0xff]  ;;  %v455_v3 = vld [vmem:[%s213_s26 + $0x28] sm:$0xff]  ;;  %p445_p7 = scmp.ne.s32.totalorder %s537_s12, 2 }
  0x16   : > { %290 = vmatpush.bf16.msra.mxu0 %v457_v1  ;;  %v454_v4 = vld [vmem:[%s213_s26 + $0x20] sm:$0xff]  ;;  %v453_v5 = vld [vmem:[%s213_s26 + $0x18] sm:$0xff]  ;;  %v452_v6 = vld [vmem:[%s213_s26 + $0x10] sm:$0xff] }
  0x17   : > { %v451_v7 = vld [vmem:[%s213_s26 + $0x8] sm:$0xff]  ;;  %v450_v8 = vld [vmem:[%s213_s26] sm:$0xff] }
  0x18   : > { %v240_v9 = vld [vmem:[%s205_s22] sm:$0xff] }
  0x19   : > { %v241_v10 = vpack.c.bf16 %v240_v9, %v240_v9 }
  0x1a   : > { %291 = vmatpush.bf16.msra.mxu0 %v456_v2 }
  0x1b   : > { %v239_v11 = vld [vmem:[#allocation2] sm:$0xff] }
  0x1e   : > { %292 = vmatpush.bf16.msra.mxu0 %v455_v3 }
  0x22   : > { %293 = vmatpush.bf16.msra.mxu0 %v454_v4 }
  0x26   : > { %294 = vmatpush.bf16.msra.mxu0 %v453_v5 }
  0x2a   : > { %295 = vmatpush.bf16.msra.mxu0 %v452_v6 }
  0x2e   : > { %296 = vmatpush.bf16.msra.mxu0 %v451_v7 }
  0x32   : > { %297 = vmatpush.bf16.msra.mxu0 %v450_v8 }
  0x35   : > { %298 = vmatmul.bf16.vlgmr.msra.gmra.mxu0 %v241_v10 }
  0xb2   : > { %v299_v12 = vpop.f32.mrf.mxu0 }
  0xb3   : > { %v303_v13 = vadd.f32 %v299_v12, %v239_v11 }
  0xb5   : > { %304 = vst [vmem:[#allocation2] sm:$0xff] %v303_v13 }
  0xb6   : > { %308 = sbr.rel (%p445_p7) target bundleno = 192 (0xc0), region = 40 }
  0xba   : > { %v301_v14 = vpop.f32.mrf.mxu0 }
  0xbb   : > { %v490_v16 = vld [vmem:[%s620_s2] ss:$0 sm:$0xff] }
  0xbc   : > { %v309_v15 = vld [vmem:[#allocation2] sm:$0xff] }
  0xbd   : > { %v314_v17 = vadd.f32 %v490_v16, %v309_v15 }
  0xbf   : > { %315 = vst [vmem:[#allocation3] sm:$0xff] %v314_v17 }
  0xc0 PF: > { %p462_p8 = scmp.eq.s32.totalorder %s404_s15, 2  ;;  %s326_s4 = sshll.u32 %s621_s3, 4  ;;  %s327_s4 = int_to_ptr.hbm [resolvable:$true] %s326_s4 }
  0xc1   : > { %s548_s5 = smov [#allocation3]  }
  0xc2   : > { %s324_s6 = sshll.u32 %s548_s5, 4  ;;  %s325_s6 = int_to_ptr.vmem [resolvable:$true] %s324_s6 }
  0xc3   : > { %459 = dma.vmem_to_hbm [thread:$0]  (%p462_p8), %s325_s6, 128, %s327_s4, [#allocation4]  }
  0xc4   : > { %532 = dma.done.wait (%p462_p8), [#allocation4], 128  }
  0xc5   : > { %534 = vsyncadd (%p462_p8), [#allocation4], 4294967168 }
  0xc6 PF: > { %s14_s14 = sadd.s32 1, %s545_s14   ;;  %s622_s12 = smov %s541_s13 }
  0xc7   : > { %p11_p9 = scmp.ge.s32.totalorder %s14_s14, 5   ;;  %s623_s13 = smov %s625_s16 }
  0xc9   :  { %13 = sbr.rel (!%p11_p9) target bundleno = 2 (0x2), region = 74 }
  0xce   :  { %340 = vsyncpa [#allocation4], 1 }
  0xcf   :  { %342 = vsyncpa [#allocation4 + $0x1], 1 }

// kernel: feedforward_pallas.3
= control target key start
LH: loop header
LB: loop body
LE: loop exit
PB: predicated region body
PF: predicated region fallthrough
CT: control target
= control target key end

     0   :  { %s1017_s0 = inlined_call_operand.vmem [shape: f32[8,256], index: 0, kind: input, shape index: {}]   ;;  %s1018_s1 = inlined_call_operand.hbm [shape: bf16[256,384], index: 1, kind: input, shape index: {}]   ;;  %s1019_s2 = inlined_call_operand.hbm [shape: f32[1,384], index: 2, kind: input, shape index: {}]   ;;  %s1020_s3 = inlined_call_operand.vmem [shape: f32[8,384], index: 3, kind: output, shape index: {}]  }
   0x1   :  { %1022 = sst [smem:[#allocation10_spill]] %s1018_s1 }
   0x2   :  { %8 = vsyncpa [#allocation4], 0 }
   0x3   :  { %10 = vsyncpa [#allocation4 + $0x1], 0 }
   0x4   :  { %11 = vsyncpa [#allocation6], 0 }
   0x5   :  { %13 = vsyncpa [#allocation6 + $0x1], 0  ;;  %s810_s12 = smov 0   ;;  %s812_s13 = smov 0  }
   0x6   :  { %s814_s14 = smov 0   ;;  %s816_s15 = smov 0  }
   0x7   :  { %s818_s16 = smov 0   ;;  %s820_s17 = smov 0  }
   0x8   :  { %s822_s18 = smov 0   ;;  %s824_s19 = smov 0  }
   0x9   :  { %s826_s20 = smov 0   ;;  %s828_s21 = smov 0  }
   0xa   :  { %s830_s22 = smov 0  }
   0xb LB: > { %s28_s23 = sadd.s32 1, %s776_s20  ;;  %p73_p1 = scmp.ne.s32.totalorder %s764_s17, %s760_s16  ;;  %s784_s22 = sphi %s830_s22, %s19_s22   ;;  %s780_s21 = sphi %s828_s21, %s1040_s21   ;;  %s776_s20 = sphi %s826_s20, %s1039_s20   ;;  %s772_s19 = sphi %s824_s19, %s1038_s19   ;;  %s768_s18 = sphi %s822_s18, %s1037_s18   ;;  %s764_s17 = sphi %s820_s17, %s1036_s17   ;;  %s760_s16 = sphi %s818_s16, %s1035_s16   ;;  %s756_s15 = sphi %s816_s15, %s1034_s15   ;;  %s752_s14 = sphi %s814_s14, %s1033_s14   ;;  %s748_s13 = sphi %s812_s13, %s1032_s13   ;;  %s744_s12 = sphi %s810_s12, %s1031_s12  }
   0xc   : > { %p866_p0 = scmp.ge.s32.totalorder %s28_s23, 2  ;;  %p74_p2 = scmp.eq.s32.totalorder %s784_s22, 0 }
   0xd   : > { %p536_p4 = scmp.lt.s32.totalorder %s784_s22, 6  ;;  %s66_s25 = sadd.s32 1, %s764_s17 }
   0xe   : > { %s1042_s23 = smov (%p866_p0, %s28_s23), 0  ;;  %p75_p3 = por %p74_p2, %p73_p1 }
   0xf   : > { %s162_s26 = sand.u32 1, %s764_s17   ;;  %s524_s28 = smul.u32 48, %s776_s20 }
  0x10   : > { %s472_s27 = sshll.u32 %s162_s26, 6  ;;  %p530_p5 = pnand %p536_p4, %p75_p3 }
  0x11   : > { %s166_s29 = scalar_lea.vmem [#allocation3], %s472_s27  ;;  %s171_s4 = sadd.s32 %s780_s21, %s524_s28 }
  0x12   : > { %s176_s30 = sshll.u32 %s166_s29, 4  ;;  %s475_s5 = sshll.u32 %s171_s4, 2  ;;  %s177_s30 = int_to_ptr.vmem [resolvable:$true] %s176_s30 }
  0x13   : > { %s1024_s1 = sld [smem:[#allocation10_spill]]  ;;  %s163_s10 = scalar_lea.sflag [#allocation4], %s162_s26 }
  0x14   : > { %s786_s11 = smov 192   ;;  %s787_s27 = smov 64  }
  0x15   : > { %s788_s28 = smov 4   ;;  %p476_p6 = scmp.ge.s32.totalorder %s784_s22, 1 }
  0x16   : > { %p201_p7 = scmp.lt.s32.totalorder %s784_s22, 7  ;;  %s468_s4 = sadd.s32 4294967295, %s784_s22  }
  0x17   : > { %p79_p9 = scmp.ne.s32.totalorder %s760_s16, %s756_s15  ;;  %s61_s26 = ssub.s32 %s776_s20, %s1042_s23 }
  0x18   : > { %p891_p8 = pnand %p476_p6, %p201_p7  ;;  %p80_p10 = scmp.eq.s32.totalorder %s468_s4, 0 }
  0x19   : > { %s173_s8 = scalar_lea.hbm %s1024_s1, %s475_s5  ;;  %s31_s5 = sadd.s32 1, %s780_s21 }
  0x1a   : > { %s174_s9 = sshll.u32 %s173_s8, 4  ;;  %s1044_s5 = smov (!%p866_p0, %s31_s5), %s780_s21  ;;  %s175_s9 = int_to_ptr.hbm [resolvable:$true] %s174_s9 }
  0x1b   : > { %532 = dma.hbm_to_vmem [thread:$0]  (!%p530_p5), %s175_s9, 1024, %s177_s30, %s163_s10, %s786_s11, %s787_s27, %s788_s28  }
  0x1c   : > { %p33_p11 = scmp.ge.s32.totalorder %s1044_s5, 3  ;;  %p99_p12 = scmp.ne.s32.totalorder %s752_s14, %s748_s13 }
  0x1d   : > { %p906_p13 = por %p80_p10, %p79_p9  ;;  %p105_p1 = scmp.ne.s32.totalorder %s748_s13, %s744_s12 }
  0x1e   : > { %s1046_s5 = smov (%p33_p11, %s1044_s5), 0  ;;  %s92_s15 = sadd.s32 1, %s752_s14 }
  0x1f   : > { %1027 = sst [smem:[#allocation9_spill]] %s1046_s5  ;;  %p915_p3 = por %p105_p1, %p80_p10 }
  0x20   : > { %s62_s6 = ssub.s32 %s780_s21, %s1046_s5  ;;  %p923_p0 = por %p99_p12, %p74_p2 }
  0x21   : > { %s63_s8 = sor.u32 %s62_s6, %s61_s26  ;;  %p90_p5 = scmp.eq.s32.totalorder %s62_s6, 0 }
  0x22   : > { %p64_p6 = scmp.eq.s32.totalorder %s63_s8, 0  ;;  %s186_s12 = sand.u32 1, %s752_s14  }
  0x23   : > { %s929_s9 = scalar_select %p90_p5, %s752_s14, %s92_s15  }
  0x24   : > { %s934_s10 = scalar_select %p64_p6, %s764_s17, %s66_s25  }
  0x25   : > { %s192_s28 = scalar_lea.hbm %s1019_s2, %s780_s21  ;;  %s189_s1 = scalar_lea.vmem [#allocation5], %s186_s12 }
  0x26   : > { %s194_s4 = sshll.u32 %s192_s28, 4  ;;  %s196_s5 = sshll.u32 %s189_s1, 4  ;;  %s195_s4 = int_to_ptr.hbm [resolvable:$true] %s194_s4  ;;  %s197_s5 = int_to_ptr.vmem [resolvable:$true] %s196_s5 }
  0x27   : > { %p533_p2 = pnand %p536_p4, %p923_p0  ;;  %s187_s26 = scalar_lea.sflag [#allocation6], %s186_s12 }
  0x28   : > { %205 = sbr.rel (%p891_p8) target bundleno = 232 (0xe8), region = 32  ;;  %s207_s25 = sand.u32 (!%p891_p8), 1, %s760_s16  }
  0x29   : > { %535 = dma.hbm_to_vmem [thread:$0]  (!%p533_p2), %s195_s4, 16, %s197_s5, %s187_s26  }
  0x2a   : > { %s477_s15 = sshll.u32 (!%p891_p8), %s207_s25, 6  ;;  %s208_s6 = scalar_lea.sflag (!%p891_p8), [#allocation4], %s207_s25 }
  0x2b   : > { %s947_s8 = scalar_lea.vmem (!%p891_p8), [#allocation3], %s477_s15 }
  0x2d   : > { %735 = dma.done.wait (%p906_p13), %s208_s6, 1024  }
  0x2e   : > { %737 = vsyncadd (%p906_p13), %s208_s6, 4294966272  ;;  %s217_s1 = sand.u32 1, %s748_s13  }
  0x2f   : > { %s218_s7 = scalar_lea.sflag [#allocation6], %s217_s1  ;;  %s954_s5 = scalar_lea.vmem [#allocation5], %s217_s1 }
  0x30   : > { %739 = dma.done.wait (%p915_p3), %s218_s7, 16  }
  0x31   : > { %741 = vsyncadd (%p915_p3), %s218_s7, 4294967280  ;;  %p251_p4 = scmp.lt.s32.totalorder %s768_s18, 1  ;;  %p256_p7 = scmp.lt.s32.totalorder %s772_s19, 2 }
  0x32   : > { %p480_p8 = scmp.ne.s32.totalorder %s768_s18, 0 }
  0x33   : > { %s252_s29 = scalar_select %p251_p4, %s768_s18, 1 }
  0x34   : > { %s1048_s19 = smov (!%p256_p7, %s772_s19), 2  ;;  %263 = sbr.rel (%p480_p8) target bundleno = 59 (0x3b), region = 44 }
  0x35   : > { %s478_s30 = sshll.u32 %s252_s29, 3  ;;  %s479_s28 = sshll.u32 %s1048_s19, 3 }
  0x36   : > { %s254_s27 = scalar_lea.vmem %s1017_s0, %s478_s30  ;;  %s970_s25 = scalar_lea.vmem %s1020_s3, %s479_s28 }
  0x39   : > { %v789_v0 = vmov 0.0  }
  0x3a   : > { %264 = vst [vmem:[#allocation2] sm:$0xff] %v789_v0 }
  0x3b PF: > { %v523_v1 = vld [vmem:[%s947_s8 + $0x38] sm:$0xff]  ;;  %v522_v2 = vld [vmem:[%s947_s8 + $0x30] sm:$0xff]  ;;  %v521_v3 = vld [vmem:[%s947_s8 + $0x28] sm:$0xff]  ;;  %p513_p9 = scmp.ne.s32.totalorder %s768_s18, 1 }
  0x3c   : > { %332 = vmatpush.bf16.msra.mxu0 %v523_v1  ;;  %v520_v4 = vld [vmem:[%s947_s8 + $0x20] sm:$0xff]  ;;  %v519_v5 = vld [vmem:[%s947_s8 + $0x18] sm:$0xff]  ;;  %v518_v6 = vld [vmem:[%s947_s8 + $0x10] sm:$0xff] }
  0x3d   : > { %v517_v7 = vld [vmem:[%s947_s8 + $0x8] sm:$0xff]  ;;  %v516_v8 = vld [vmem:[%s947_s8] sm:$0xff]  ;;  %v282_v9 = vld [vmem:[%s254_s27] sm:$0xff] }
  0x3e   : > { %v283_v10 = vpack.c.bf16 %v282_v9, %v282_v9 }
  0x40   : > { %333 = vmatpush.bf16.msra.mxu0 %v522_v2 }
  0x41   : > { %v281_v11 = vld [vmem:[#allocation2] sm:$0xff] }
  0x44   : > { %334 = vmatpush.bf16.msra.mxu0 %v521_v3 }
  0x48   : > { %335 = vmatpush.bf16.msra.mxu0 %v520_v4 }
  0x4c   : > { %336 = vmatpush.bf16.msra.mxu0 %v519_v5 }
  0x50   : > { %337 = vmatpush.bf16.msra.mxu0 %v518_v6 }
  0x54   : > { %338 = vmatpush.bf16.msra.mxu0 %v517_v7 }
  0x58   : > { %339 = vmatpush.bf16.msra.mxu0 %v516_v8 }
  0x5b   : > { %340 = vmatmul.bf16.vlgmr.msra.gmra.mxu0 %v283_v10 }
  0xd8   : > { %v341_v12 = vpop.f32.mrf.mxu0 }
  0xd9   : > { %v345_v13 = vadd.f32 %v341_v12, %v281_v11 }
  0xdb   : > { %346 = vst [vmem:[#allocation2] sm:$0xff] %v345_v13 }
  0xdc   : > { %350 = sbr.rel (%p513_p9) target bundleno = 232 (0xe8), region = 48 }
  0xe0   : > { %v343_v14 = vpop.f32.mrf.mxu0 }
  0xe1   : > { %v629_v16 = vld [vmem:[%s954_s5] ss:$0 sm:$0xff] }
  0xe2   : > { %v351_v15 = vld [vmem:[#allocation2] sm:$0xff] }
  0xe3   : > { %v356_v17 = vadd.f32 %v629_v16, %v351_v15 }
  0xe5   : > { %v357_v18 = vmax.f32 %v356_v17, 0.0 }
  0xe7   : > { %358 = vst [vmem:[%s970_s25] sm:$0xff] %v357_v18 }
  0xe8 PF: > { %s19_s22 = sadd.s32 1, %s784_s22   ;;  %s1030_s24 = sld [smem:[#allocation9_spill]] }
  0xe9   : > { %p16_p10 = scmp.ge.s32.totalorder %s19_s22, 8   ;;  %s1031_s12 = smov %s748_s13 }
  0xea   : > { %s1032_s13 = smov %s752_s14  ;;  %s1033_s14 = smov %s929_s9 }
  0xeb   : > { %s1034_s15 = smov %s760_s16  ;;  %s1035_s16 = smov %s764_s17 }
  0xec   : > { %s1036_s17 = smov %s934_s10  ;;  %s1037_s18 = smov %s776_s20 }
  0xed   : > { %s1038_s19 = smov %s780_s21  ;;  %s1039_s20 = smov %s1042_s23 }
  0xee   : > { %s1040_s21 = smov %s1030_s24  ;;  %18 = sbr.rel (!%p16_p10) target bundleno = 11 (0xb), region = 96 }
  0xf3   :  { %378 = vsyncpa [#allocation4], 1 }
  0xf4   :  { %380 = vsyncpa [#allocation4 + $0x1], 1 }
  0xf5   :  { %381 = vsyncpa [#allocation6], 1 }
  0xf6   :  { %383 = vsyncpa [#allocation6 + $0x1], 1 }

// kernel: feedforward_pallas.4
= control target key start
LH: loop header
LB: loop body
LE: loop exit
PB: predicated region body
PF: predicated region fallthrough
CT: control target
= control target key end

     0   :  { %s1097_s0 = inlined_call_operand.vmem [shape: f32[8,384], index: 0, kind: input, shape index: {}]   ;;  %s1098_s1 = inlined_call_operand.hbm [shape: bf16[7,384,384], index: 1, kind: input, shape index: {}]   ;;  %s1099_s2 = inlined_call_operand.hbm [shape: f32[7,1,384], index: 2, kind: input, shape index: {}]   ;;  %s1100_s3 = inlined_call_operand.vmem [shape: f32[8,384], index: 3, kind: output, shape index: {}]  }
   0x1   :  { %1107 = sst [smem:[#allocation15_spill]] %s1097_s0 }
   0x2   :  { %1108 = sst [smem:[#allocation16_spill]] %s1098_s1 }
   0x3   :  { %1109 = sst [smem:[#allocation17_spill]] %s1100_s3 }
   0x4   :  { %8 = vsyncpa [#allocation6], 0 }
   0x5   :  { %10 = vsyncpa [#allocation6 + $0x1], 0 }
   0x6   :  { %11 = vsyncpa [#allocation8], 0 }
   0x7   :  { %13 = vsyncpa [#allocation8 + $0x1], 0  ;;  %s854_s12 = smov 0   ;;  %s856_s13 = smov 0  }
   0x8   :  { %s858_s14 = smov 0   ;;  %s860_s15 = smov 0  }
   0x9   :  { %s862_s16 = smov 0   ;;  %s864_s17 = smov 0  }
   0xa   :  { %s866_s18 = smov 0   ;;  %s868_s19 = smov 0  }
   0xb   :  { %s870_s20 = smov 0   ;;  %s872_s21 = smov 0  }
   0xc   :  { %s874_s22 = smov 0   ;;  %s876_s23 = smov 0  }
   0xd   :  { %s878_s24 = smov 0  }
   0xe LB: > { %1110 = sst [smem:[#allocation11_spill]] %s816_s21  ;;  %s31_s25 = sadd.s32 1, %s816_s21  ;;  %s828_s24 = sphi %s878_s24, %s19_s24   ;;  %s824_s23 = sphi %s876_s23, %s1138_s23   ;;  %s820_s22 = sphi %s874_s22, %s1137_s22   ;;  %s816_s21 = sphi %s872_s21, %s1136_s21   ;;  %s812_s20 = sphi %s870_s20, %s1135_s20   ;;  %s808_s19 = sphi %s868_s19, %s1134_s19   ;;  %s804_s18 = sphi %s866_s18, %s1123_s18   ;;  %s800_s17 = sphi %s864_s17, %s1133_s17   ;;  %s796_s16 = sphi %s862_s16, %s1132_s16   ;;  %s792_s15 = sphi %s860_s15, %s1131_s15   ;;  %s788_s14 = sphi %s858_s14, %s1130_s14   ;;  %s784_s13 = sphi %s856_s13, %s1129_s13   ;;  %s780_s12 = sphi %s854_s12, %s1128_s12  }
   0xf   : > { %p920_p0 = scmp.ge.s32.totalorder %s31_s25, 3  ;;  %p77_p1 = scmp.ne.s32.totalorder %s800_s17, %s796_s16 }
  0x10   : > { %p78_p2 = scmp.eq.s32.totalorder %s828_s24, 0  ;;  %p548_p4 = scmp.lt.s32.totalorder %s828_s24, 63 }
  0x11   : > { %s1140_s25 = smov (%p920_p0, %s31_s25), 0  ;;  %s159_s27 = sand.u32 1, %s800_s17  }
  0x12   : > { %1112 = sst [smem:[#allocation12_spill]] %s1140_s25  ;;  %p79_p3 = por %p78_p2, %p77_p1 }
  0x13   : > { %s534_s28 = smul.u32 48, %s816_s21  ;;  %s480_s29 = sshll.u32 %s159_s27, 6 }
  0x14   : > { %s535_s4 = smul.u32 144, %s824_s23  ;;  %s163_s5 = scalar_lea.vmem [#allocation5], %s480_s29 }
  0x15   : > { %s168_s30 = sadd.s32 %s820_s22, %s534_s28  ;;  %s175_s6 = sshll.u32 %s163_s5, 4  ;;  %s176_s6 = int_to_ptr.vmem [resolvable:$true] %s175_s6 }
  0x16   : > { %p542_p5 = pnand %p548_p4, %p79_p3  ;;  %s170_s7 = sadd.s32 %s535_s4, %s168_s30 }
  0x17   : > { %s483_s8 = sshll.u32 %s170_s7, 2  ;;  %s1113_s1 = sld [smem:[#allocation16_spill]] }
  0x18   : > { %p484_p6 = scmp.ge.s32.totalorder %s828_s24, 1  ;;  %s160_s29 = scalar_lea.sflag [#allocation6], %s159_s27 }
  0x19   : > { %s830_s5 = smov 192   ;;  %s831_s3 = smov 64  }
  0x1a   : > { %s832_s30 = smov 4   ;;  %s70_s4 = sadd.s32 1, %s800_s17 }
  0x1b   : > { %p202_p7 = scmp.lt.s32.totalorder %s828_s24, 64  ;;  %s34_s9 = sadd.s32 1, %s820_s22 }
  0x1c   : > { %s1142_s9 = smov (!%p920_p0, %s34_s9), %s820_s22  ;;  %s38_s27 = sadd.s32 1, %s824_s23 }
  0x1d   : > { %s172_s11 = scalar_lea.hbm %s1113_s1, %s483_s8  ;;  %p946_p8 = pnand %p484_p6, %p202_p7 }
  0x1e   : > { %s173_s28 = sshll.u32 %s172_s11, 4  ;;  %s477_s8 = sadd.s32 4294967295, %s828_s24   ;;  %s174_s28 = int_to_ptr.hbm [resolvable:$true] %s173_s28 }
  0x1f   : > { %544 = dma.hbm_to_vmem [thread:$0]  (!%p542_p5), %s174_s28, 1024, %s176_s6, %s160_s29, %s830_s5, %s831_s3, %s832_s30  }
  0x20   : > { %p36_p9 = scmp.ge.s32.totalorder %s1142_s9, 3  ;;  %p83_p10 = scmp.ne.s32.totalorder %s796_s16, %s792_s15 }
  0x21   : > { %s64_s3 = ssub.s32 %s816_s21, %s1140_s25  ;;  %p84_p11 = scmp.eq.s32.totalorder %s477_s8, 0 }
  0x22   : > { %s1144_s9 = smov (%p36_p9, %s1142_s9), 0  ;;  %s1146_s27 = smov (!%p36_p9, %s38_s27), %s824_s23 }
  0x23   : > { %1115 = sst [smem:[#allocation13_spill]] %s1144_s9  ;;  %p963_p12 = por %p84_p11, %p83_p10 }
  0x24   : > { %s98_s10 = sadd.s32 1, %s788_s14  ;;  %p40_p13 = scmp.ge.s32.totalorder %s1146_s27, 7 }
  0x25   : > { %p105_p0 = scmp.ne.s32.totalorder %s788_s14, %s784_s13  ;;  %s66_s26 = ssub.s32 %s820_s22, %s1144_s9 }
  0x26   : > { %p111_p1 = scmp.ne.s32.totalorder %s784_s13, %s780_s12  ;;  %s1148_s27 = smov (%p40_p13, %s1146_s27), 0 }
  0x27   : > { %1117 = sst [smem:[#allocation14_spill]] %s1148_s27  ;;  %s185_s11 = sand.u32 1, %s788_s14  }
  0x28   : > { %p976_p3 = por %p111_p1, %p84_p11  ;;  %s63_s28 = ssub.s32 %s824_s23, %s1148_s27 }
  0x29   : > { %p107_p5 = por %p105_p0, %p78_p2  ;;  %s65_s29 = sor.u32 %s64_s3, %s63_s28 }
  0x2a   : > { %s95_s5 = sor.u32 %s66_s26, %s63_s28  ;;  %s67_s30 = sor.u32 %s66_s26, %s65_s29 }
  0x2b   : > { %p96_p6 = scmp.eq.s32.totalorder %s95_s5, 0  ;;  %p68_p7 = scmp.eq.s32.totalorder %s67_s30, 0 }
  0x2c   : > { %s536_s1 = smul.u32 3, %s824_s23  ;;  %s188_s9 = scalar_lea.vmem [#allocation7], %s185_s11 }
  0x2d   : > { %s986_s8 = scalar_select %p96_p6, %s788_s14, %s98_s10  }
  0x2e   : > { %s991_s12 = scalar_select %p68_p7, %s800_s17, %s70_s4  }
  0x2f   : > { %s197_s25 = sshll.u32 %s188_s9, 4  ;;  %p545_p9 = pnand %p548_p4, %p107_p5  ;;  %s198_s25 = int_to_ptr.vmem [resolvable:$true] %s197_s25 }
  0x30   : > { %s192_s21 = sadd.s32 %s820_s22, %s536_s1  ;;  %s186_s26 = scalar_lea.sflag [#allocation8], %s185_s11 }
  0x31   : > { %s193_s3 = scalar_lea.hbm %s1099_s2, %s192_s21  ;;  %206 = sbr.rel (%p946_p8) target bundleno = 271 (0x10f), region = 32 }
  0x32   : > { %s195_s28 = sshll.u32 %s193_s3, 4  ;;  %s208_s4 = sand.u32 (!%p946_p8), 1, %s796_s16   ;;  %s196_s28 = int_to_ptr.hbm [resolvable:$true] %s195_s28 }
  0x33   : > { %547 = dma.hbm_to_vmem [thread:$0]  (!%p545_p9), %s196_s28, 16, %s198_s25, %s186_s26  }
  0x34   : > { %s485_s10 = sshll.u32 (!%p946_p8), %s208_s4, 6  ;;  %s209_s9 = scalar_lea.sflag (!%p946_p8), [#allocation6], %s208_s4 }
  0x35   : > { %s1003_s29 = scalar_lea.vmem (!%p946_p8), [#allocation5], %s485_s10 }
  0x36   : > { %771 = dma.done.wait (%p963_p12), %s209_s9, 1024  }
  0x37   : > { %773 = vsyncadd (%p963_p12), %s209_s9, 4294966272  ;;  %s218_s0 = sand.u32 1, %s784_s13  }
  0x38   : > { %s219_s1 = scalar_lea.sflag [#allocation8], %s218_s0  ;;  %s1010_s21 = scalar_lea.vmem [#allocation7], %s218_s0 }
  0x39   : > { %775 = dma.done.wait (%p976_p3), %s219_s1, 16  }
  0x3a   : > { %777 = vsyncadd (%p976_p3), %s219_s1, 4294967280  ;;  %p245_p2 = scmp.eq.s32.totalorder %s812_s20, 0  ;;  %p246_p4 = scmp.eq.s32.totalorder %s808_s19, 0 }
  0x3b   : > { %p249_p10 = scmp.eq.s32.totalorder %s804_s18, 0 }
  0x3c   : > { %p247_p8 = pnand %p246_p4, %p245_p2 }
  0x3e   : > { %p248_p11 = pneg %p247_p8 }
  0x40   : > { %p250_p12 = pnand %p249_p10, %p248_p11 }
  0x41   : > { %s1119_s27 = sld [smem:[#allocation15_spill]] (!%p250_p12) }
  0x42   : > { %253 = sbr.rel (%p250_p12) target bundleno = 75 (0x4b), region = 44 }
  0x47   : > { %v254_v0 = vld [vmem:[%s1119_s27] sm:$0xff]  ;;  %v256_v1 = vld [vmem:[%s1119_s27 + $0x8] sm:$0xff]  ;;  %v259_v2 = vld [vmem:[%s1119_s27 + $0x10] sm:$0xff] }
  0x48   : > { %255 = vst [vmem:[#allocation2] sm:$0xff] %v254_v0 }
  0x49   : > { %258 = vst [vmem:[#allocation2 + $0x8] sm:$0xff] %v256_v1 }
  0x4a   : > { %261 = vst [vmem:[#allocation2 + $0x10] sm:$0xff] %v259_v2 }
  0x4b PF: > { %p486_p13 = scmp.ne.s32.totalorder %s804_s18, 0 }
  0x4d   : > { %264 = sbr.rel (%p486_p13) target bundleno = 84 (0x54), region = 48 }
  0x52   : > { %v833_v3 = vmov 0.0  }
  0x53   : > { %265 = vst [vmem:[#allocation4] sm:$0xff] %v833_v3 }
  0x54 PF: > { %v533_v4 = vld [vmem:[%s1003_s29 + $0x38] sm:$0xff]  ;;  %v532_v5 = vld [vmem:[%s1003_s29 + $0x30] sm:$0xff]  ;;  %v531_v6 = vld [vmem:[%s1003_s29 + $0x28] sm:$0xff]  ;;  %s487_s30 = sshll.u32 %s804_s18, 3  ;;  %p520_p0 = scmp.ne.s32.totalorder %s804_s18, 2 }
  0x55   : > { %335 = vmatpush.bf16.msra.mxu0 %v533_v4  ;;  %v530_v7 = vld [vmem:[%s1003_s29 + $0x20] sm:$0xff]  ;;  %v529_v8 = vld [vmem:[%s1003_s29 + $0x18] sm:$0xff]  ;;  %v528_v9 = vld [vmem:[%s1003_s29 + $0x10] sm:$0xff]  ;;  %s284_s3 = scalar_lea.vmem [#allocation2], %s487_s30  ;;  %s521_s28 = sshll.u32 (!%p520_p0), %s808_s19, 3 }
  0x56   : > { %v527_v10 = vld [vmem:[%s1003_s29 + $0x8] sm:$0xff]  ;;  %v526_v11 = vld [vmem:[%s1003_s29] sm:$0xff]  ;;  %s361_s26 = scalar_lea.vmem (!%p520_p0), [#allocation2], %s521_s28  ;;  %s365_s4 = scalar_lea.vmem (!%p520_p0), [#allocation3], %s521_s28 }
  0x57   : > { %v285_v12 = vld [vmem:[%s284_s3] sm:$0xff]  ;;  %p522_p1 = scmp.ne.s32.totalorder (!%p520_p0), %s808_s19, 2 }
  0x58   : > { %v286_v13 = vpack.c.bf16 %v285_v12, %v285_v12 }
  0x59   : > { %336 = vmatpush.bf16.msra.mxu0 %v532_v5 }
  0x5a   : > { %v282_v14 = vld [vmem:[#allocation4] sm:$0xff] }
  0x5d   : > { %337 = vmatpush.bf16.msra.mxu0 %v531_v6 }
  0x61   : > { %338 = vmatpush.bf16.msra.mxu0 %v530_v7 }
  0x65   : > { %339 = vmatpush.bf16.msra.mxu0 %v529_v8 }
  0x69   : > { %340 = vmatpush.bf16.msra.mxu0 %v528_v9 }
  0x6d   : > { %341 = vmatpush.bf16.msra.mxu0 %v527_v10 }
  0x71   : > { %342 = vmatpush.bf16.msra.mxu0 %v526_v11 }
  0x74   : > { %343 = vmatmul.bf16.vlgmr.msra.gmra.mxu0 %v286_v13 }
  0xf1   : > { %v344_v15 = vpop.f32.mrf.mxu0 }
  0xf2   : > { %v348_v16 = vadd.f32 %v344_v15, %v282_v14 }
  0xf4   : > { %349 = vst [vmem:[#allocation4] sm:$0xff] %v348_v16 }
  0xf5   : > { %353 = sbr.rel (%p520_p0) target bundleno = 271 (0x10f), region = 52 }
  0xf9   : > { %v346_v17 = vpop.f32.mrf.mxu0 }
  0xfa   : > { %v657_v19 = vld [vmem:[%s1010_s21] ss:$0 sm:$0xff]  ;;  %p523_p3 = scmp.ne.s32.totalorder (!%p522_p1), %s812_s20, 6 }
  0xfb   : > { %v354_v18 = vld [vmem:[#allocation4] sm:$0xff]  ;;  %v362_v21 = vld [vmem:[%s361_s26] sm:$0xff] }
  0xfc   : > { %v359_v20 = vadd.f32 %v657_v19, %v354_v18  ;;  %v363_v22 = vmax.f32 %v362_v21, 0.0  ;;  %370 = sbr.rel (%p522_p1) target bundleno = 271 (0x10f), region = 56 }
  0xfe   : > { %v364_v23 = vadd.f32 %v363_v22, %v359_v20 }
 0x100   : > { %366 = vst [vmem:[%s365_s4] sm:$0xff] %v364_v23 }
 0x101   : > { %s1120_s9 = sld [smem:[#allocation17_spill]] (!%p523_p3) }
 0x106   : > { %380 = sbr.rel (%p523_p3) target bundleno = 271 (0x10f), region = 60 }
 0x107   : > { %v371_v24 = vld [vmem:[#allocation3] sm:$0xff]  ;;  %v372_v25 = vld [vmem:[#allocation3 + $0x8] sm:$0xff]  ;;  %v373_v26 = vld [vmem:[#allocation3 + $0x10] sm:$0xff] }
 0x108   : > { %374 = vst [vmem:[#allocation2] sm:$0xff] %v371_v24 }
 0x109   : > { %375 = vst [vmem:[#allocation2 + $0x8] sm:$0xff] %v372_v25 }
 0x10a   : > { %376 = vst [vmem:[#allocation2 + $0x10] sm:$0xff] %v373_v26 }
 0x10b   : > { %v381_v27 = vld [vmem:[#allocation3] sm:$0xff]  ;;  %v384_v28 = vld [vmem:[#allocation3 + $0x8] sm:$0xff]  ;;  %v387_v29 = vld [vmem:[#allocation3 + $0x10] sm:$0xff] }
 0x10c   : > { %382 = vst [vmem:[%s1120_s9] sm:$0xff] %v381_v27 }
 0x10d   : > { %385 = vst [vmem:[%s1120_s9 + $0x8] sm:$0xff] %v384_v28 }
 0x10e   : > { %388 = vst [vmem:[%s1120_s9 + $0x10] sm:$0xff] %v387_v29 }
 0x10f PF: > { %s19_s24 = sadd.s32 1, %s828_s24   ;;  %s1122_s21 = smov %s991_s12 }
 0x110   : > { %p1053_p5 = scmp.ge.s32.totalorder %s19_s24, 65   ;;  %s1123_s18 = sld [smem:[#allocation11_spill]] }
 0x111   : > { %s1124_s25 = sld [smem:[#allocation12_spill]]  ;;  %s1128_s12 = smov %s784_s13 }
 0x112   : > { %s1125_s7 = sld [smem:[#allocation13_spill]]  ;;  %s1129_s13 = smov %s788_s14 }
 0x113   : > { %s1126_s6 = sld [smem:[#allocation14_spill]]  ;;  %s1130_s14 = smov %s986_s8 }
 0x114   : > { %s1131_s15 = smov %s796_s16  ;;  %s1132_s16 = smov %s800_s17 }
 0x115   : > { %s1133_s17 = smov %s1122_s21  ;;  %s1134_s19 = smov %s820_s22 }
 0x116   : > { %s1135_s20 = smov %s824_s23  ;;  %18 = sbr.rel (!%p1053_p5) target bundleno = 14 (0xe), region = 108 }
 0x117   : > { %s1136_s21 = smov %s1124_s25 }
 0x118   : > { %s1137_s22 = smov %s1125_s7 }
 0x119   : > { %s1138_s23 = smov %s1126_s6 }
 0x11b   :  { %400 = vsyncpa [#allocation6], 1 }
 0x11c   :  { %402 = vsyncpa [#allocation6 + $0x1], 1 }
 0x11d   :  { %403 = vsyncpa [#allocation8], 1 }
 0x11e   :  { %405 = vsyncpa [#allocation8 + $0x1], 1 }

</bundles_post_ra>
